<compile_context>
chip_gen: v7x
topology: tpu7x:2x2x1
jax: 0.10.0
libtpu: 0.0.40
codegen_flags: <defaults>
</compile_context>

<pallas_src>
import jax
import jax.numpy as jnp
from jax.experimental import pallas as pl
from jax.experimental.pallas import tpu as pltpu


def _row_tile_kernel(x_ref, emb_ref, o_ref):
    # x_ref / emb_ref / o_ref: (TS, 128) lane-dense row tiles of one batch elem.
    o_ref[...] = (x_ref[...] + emb_ref[...]).astype(o_ref.dtype)


def _batch_block_kernel(x_ref, emb_ref, o_ref):
    # x_ref / o_ref: (TB, R, 128); emb_ref: (R, 128) broadcast over the batch tile.
    o_ref[...] = (x_ref[...] + emb_ref[...][None, :, :]).astype(o_ref.dtype)


def learned_positional_encoding(
    x,
    pos_embedding,
    *,
    tile_bytes=4 * 1024 * 1024,        # per-operand tile byte budget (HBM streaming)
    min_pallas_bytes=1 * 1024 * 1024,  # below this, let XLA fuse the add
    force_pallas=False,
    alias_x_to_out=False,              # reuse x's buffer for out (donate x at jit boundary)
):
    """x: (B, S, D); pos_embedding: (max_len, D). Returns x + pos_embedding[:S]."""
    B, S, D = x.shape
    max_len, D2 = pos_embedding.shape
    assert D == D2 and S <= max_len

    out_dtype = jnp.result_type(x.dtype, pos_embedding.dtype)
    x_item = jnp.dtype(x.dtype).itemsize
    e_item = jnp.dtype(pos_embedding.dtype).itemsize
    o_item = jnp.dtype(out_dtype).itemsize

    total = S * D
    moved_bytes = B * total * (x_item + o_item)

    # Fallbacks: non-lane-dense slab, or problem too small to amortize
    # pallas_call launch / pipeline priming -> fused XLA add.
    if total % 128 != 0 or (moved_bytes < min_pallas_bytes and not force_pallas):
        return (x + pos_embedding[:S][None, :, :]).astype(out_dtype)

    R = total // 128

    # Sublane alignment so packed dtypes (bf16 / int8) keep unmasked sublanes.
    min_item = min(x_item, e_item, o_item)
    max_item = max(x_item, e_item, o_item)
    align = max(8, 32 // min_item)

    # Byte-budgeted rows-per-tile, capped so 3 operands x 2 buffers stay well
    # under v7x's 64 MiB VMEM per TensorCore.
    per_operand_budget = min(tile_bytes, (40 * 1024 * 1024) // 6)
    rows_budget = max(align, (per_operand_budget // (128 * max_item)) // align * align)

    # Full positional table can be presented lane-dense -> no wrapper slice copy.
    table_lane_ok = (max_len * D) % 128 == 0
    table_rows = (max_len * D) // 128 if table_lane_ok else R

    x2 = x.reshape(B, R, 128)

    if R > rows_budget:
        ts = rows_budget                            # large S*D: tile the row axis
    elif B == 1 and R >= 2 * align:
        # Single batch element: split rows so there are >= 2 grid blocks and
        # both v7x TensorCores can participate.
        ts = min(rows_budget, pl.cdiv(pl.cdiv(R, 2), align) * align)
    else:
        ts = None                                   # small S*D: block over batch

    if ts is not None:
        # ---- row-tiled path: grid = (row_tiles, B), batch innermost ----
        emb2 = (pos_embedding.reshape(table_rows, 128) if table_lane_ok
                else pos_embedding[:S].reshape(R, 128))
        grid = (pl.cdiv(R, ts), B)
        in_specs = [
            pl.BlockSpec((None, ts, 128), lambda t, b: (b, t, 0)),
            pl.BlockSpec((ts, 128), lambda t, b: (t, 0)),
        ]
        out_spec = pl.BlockSpec((None, ts, 128), lambda t, b: (b, t, 0))
        kernel = _row_tile_kernel
        tile_sum = ts * 128 * (x_item + e_item + o_item)
    else:
        # ---- batch-blocked path: grid = (ceil(B/TB),) ----
        # Full table only usable if the (R,128) emb block obeys the (8,128) rule.
        full_ok = table_lane_ok and (R % 8 == 0 or table_rows == R)
        emb2 = (pos_embedding.reshape(table_rows, 128) if full_ok
                else pos_embedding[:S].reshape(R, 128))
        per_batch_bytes = R * 128 * max(x_item, o_item)
        tb = max(1, min(B, per_operand_budget // per_batch_bytes))
        if B >= 2 and pl.cdiv(B, tb) == 1:
            tb = pl.cdiv(B, 2)                      # >= 2 grid blocks for v7x megacore
        grid = (pl.cdiv(B, tb),)
        in_specs = [
            pl.BlockSpec((tb, R, 128), lambda i: (i, 0, 0)),
            pl.BlockSpec((R, 128), lambda i: (0, 0)),
        ]
        out_spec = pl.BlockSpec((tb, R, 128), lambda i: (i, 0, 0))
        kernel = _batch_block_kernel
        tile_sum = tb * R * 128 * (x_item + o_item) + R * 128 * e_item

    # Explicit scoped-VMEM limit: enough for full double buffering of the
    # chosen tiles, never above 48 MiB (v7x has 64 MiB physical per TC).
    vmem_limit = int(min(48 * 2**20, max(32 * 2**20, 2 * tile_sum + 2**20)))

    cost = pl.CostEstimate(
        flops=B * total,                            # one add per element
        transcendentals=0,
        bytes_accessed=moved_bytes + total * e_item,
    )

    io_alias = {}
    if alias_x_to_out and jnp.dtype(x.dtype) == jnp.dtype(out_dtype):
        io_alias = {0: 0}                           # x2 buffer reused as out2

    out2 = pl.pallas_call(
        kernel,
        out_shape=jax.ShapeDtypeStruct((B, R, 128), out_dtype),
        grid=grid,
        in_specs=in_specs,
        out_specs=out_spec,
        compiler_params=pltpu.CompilerParams(
            dimension_semantics=("parallel",) * len(grid),
            vmem_limit_bytes=vmem_limit,
        ),
        cost_estimate=cost,
        input_output_aliases=io_alias,
    )(x2, emb2)

    return out2.reshape(B, S, D)


if __name__ == "__main__":
    key = jax.random.PRNGKey(0)
    kx, kemb = jax.random.split(key)

    # ---- primary small shape (batch=2, seq=8, d_model=32): batch-blocked path ----
    B, S, D, MAX_LEN = 2, 8, 32, 64
    x = jax.random.normal(kx, (B, S, D), dtype=jnp.float32)
    pos_embedding = jax.random.normal(kemb, (MAX_LEN, D), dtype=jnp.float32)  # nn.Embedding ~ N(0,1)

    out = jax.block_until_ready(
        learned_positional_encoding(x, pos_embedding, force_pallas=True))
    ref = x + pos_embedding[:S][None]
    assert out.shape == (B, S, D) and out.dtype == ref.dtype
    assert jnp.allclose(out, ref, atol=1e-6), "mismatch (batch-blocked path)"

    # ---- default small-problem XLA fallback agrees with the kernel ----
    out_fb = jax.block_until_ready(learned_positional_encoding(x, pos_embedding))
    assert jnp.allclose(out_fb, ref, atol=1e-6), "mismatch (XLA fallback path)"

    # ---- row-tiled path: partial last tile + full-table emb (no wrapper slice) ----
    B2, S2, D2, ML2 = 2, 160, 32, 256
    xb = jax.random.normal(kx, (B2, S2, D2), dtype=jnp.float32)
    embb = jax.random.normal(kemb, (ML2, D2), dtype=jnp.float32)
    outb = jax.block_until_ready(
        learned_positional_encoding(xb, embb, force_pallas=True, tile_bytes=8 * 1024))
    refb = xb + embb[:S2][None]
    assert jnp.allclose(outb, refb, atol=1e-6), "mismatch (row-tiled path)"

    # ---- mixed dtype (bf16 activations, f32 table): batch-blocked + full table ----
    B3, S3, D3, ML3 = 4, 32, 32, 64
    xc = jax.random.normal(kx, (B3, S3, D3), dtype=jnp.bfloat16)
    embc = jax.random.normal(kemb, (ML3, D3), dtype=jnp.float32)
    outc = jax.block_until_ready(
        learned_positional_encoding(xc, embc, force_pallas=True))
    refc = xc + embc[:S3][None]
    assert outc.dtype == refc.dtype
    assert jnp.allclose(outc, refc, atol=1e-6), "mismatch (mixed-dtype path)"

    # ---- B == 1: rows split so the grid has >= 2 parallel blocks (v7x) ----
    B4, S4, D4, ML4 = 1, 64, 32, 64
    xd = jax.random.normal(kx, (B4, S4, D4), dtype=jnp.float32)
    embd = jax.random.normal(kemb, (ML4, D4), dtype=jnp.float32)
    outd = jax.block_until_ready(
        learned_positional_encoding(xd, embd, force_pallas=True))
    refd = xd + embd[:S4][None]
    assert jnp.allclose(outd, refd, atol=1e-6), "mismatch (B==1 row-split path)"

    print("KERNEL_OK")
</pallas_src>

<mosaic_0001>
module attributes {stable_mosaic.version = 11 : i64} {
  func.func @_batch_block_kernel(%arg0: i32, %arg1: memref<1x2x128xf32, #tpu.memory_space<vmem>>, %arg2: memref<2x128xf32, #tpu.memory_space<vmem>>, %arg3: memref<1x2x128xf32, #tpu.memory_space<vmem>>) attributes {dimension_semantics = [#tpu.dimension_semantics<parallel>], iteration_bounds = array<i64: 2>, scalar_prefetch = 0 : i64, scratch_operands = 0 : i64, tpu.core_type = #tpu.core_type<tc>, window_params = [{transform_indices = @transform_0, window_bounds = array<i64: 1, 2, 128>}, {pipeline_mode = #tpu.pipeline_mode<synchronous>, transform_indices = @transform_1, window_bounds = array<i64: 2, 128>}, {transform_indices = @transform_2, window_bounds = array<i64: 1, 2, 128>}]} {
    %c0 = arith.constant 0 : index
    %c0_0 = arith.constant 0 : index
    %c0_1 = arith.constant 0 : index
    %0 = vector.load %arg1[%c0, %c0_0, %c0_1] : memref<1x2x128xf32, #tpu.memory_space<vmem>>, vector<1x2x128xf32>
    %c0_2 = arith.constant 0 : index
    %c0_3 = arith.constant 0 : index
    %1 = vector.load %arg2[%c0_2, %c0_3] : memref<2x128xf32, #tpu.memory_space<vmem>>, vector<2x128xf32>
    %2 = vector.shape_cast %1 : vector<2x128xf32> to vector<1x2x128xf32>
    %3 = arith.addf %0, %2 : vector<1x2x128xf32>
    %c0_4 = arith.constant 0 : index
    %c0_5 = arith.constant 0 : index
    %c0_6 = arith.constant 0 : index
    %4 = vector.load %arg3[%c0_4, %c0_5, %c0_6] : memref<1x2x128xf32, #tpu.memory_space<vmem>>, vector<1x2x128xf32>
    tpu.vector_store %arg3[%c0_4, %c0_5, %c0_6], %3 {strides = array<i32>} : memref<1x2x128xf32, #tpu.memory_space<vmem>>, vector<1x2x128xf32>,
    return
  }
  func.func @transform_0(%arg0: i32) -> (i32, i32, i32) {
    %c0_i32 = arith.constant 0 : i32
    %c0_i32_0 = arith.constant 0 : i32
    %c0_i32_1 = arith.constant 0 : i32
    return %arg0, %c0_i32, %c0_i32_0 : i32, i32, i32
  }
  func.func @transform_1(%arg0: i32) -> (i32, i32) {
    %c0_i32 = arith.constant 0 : i32
    %c0_i32_0 = arith.constant 0 : i32
    %c0_i32_1 = arith.constant 0 : i32
    return %c0_i32, %c0_i32_0 : i32, i32
  }
  func.func @transform_2(%arg0: i32) -> (i32, i32, i32) {
    %c0_i32 = arith.constant 0 : i32
    %c0_i32_0 = arith.constant 0 : i32
    %c0_i32_1 = arith.constant 0 : i32
    return %arg0, %c0_i32, %c0_i32_0 : i32, i32, i32
  }
}

</mosaic_0001>

<bundles_post_ra>
// kernel: tpu_custom_call.1
= control target key start
LH: loop header
LB: loop body
LE: loop exit
PB: predicated region body
PF: predicated region fallthrough
CT: control target
= control target key end

     0   :  { %7 = vsyncpa [#allocation3], 0  ;;  %s584_s0 = inlined_call_operand.hbm [shape: f32[2,2,128], index: 0, kind: input, shape index: {}]   ;;  %s585_s1 = inlined_call_operand.vmem [shape: f32[2,128], index: 1, kind: input, shape index: {}]   ;;  %s586_s2 = inlined_call_operand.hbm [shape: f32[2,2,128], index: 2, kind: output, shape index: {}]  }
   0x1   :  { %9 = vsyncpa [#allocation3 + $0x1], 0 }
   0x2   :  { %10 = vsyncpa [#allocation4], 0 }
   0x3   :  { %12 = vsyncpa [#allocation4 + $0x1], 0  ;;  %s420_s9 = smov 0   ;;  %s422_s10 = smov 0  }
   0x4   :  { %s424_s11 = smov 0   ;;  %s426_s12 = smov 0  }
   0x5 LB: > { %s441_s13 = sadd.s32 4294967295, %s401_s12   ;;  %s247_s14 = sadd.s32 4294967294, %s401_s12   ;;  %s401_s12 = sphi %s426_s12, %s601_s12   ;;  %s397_s11 = sphi %s424_s11, %s600_s11   ;;  %s393_s10 = sphi %s422_s10, %s599_s10   ;;  %s389_s9 = sphi %s420_s9, %s598_s9  }
   0x6   : > { %s445_s15 = sadd.s32 1, %s401_s12   ;;  %s25_s16 = sadd.s32 1, %s397_s11 }
   0x7   : > { %s22_s17 = ssub.s32 %s401_s12, %s445_s15  ;;  %p32_p0 = scmp.ne.s32.totalorder %s397_s11, %s393_s10 }
   0x8   : > { %p23_p1 = scmp.eq.s32.totalorder %s22_s17, 0  ;;  %p33_p2 = scmp.eq.s32.totalorder %s401_s12, 0 }
   0x9   : > { %p38_p3 = scmp.ne.s32.totalorder %s393_s10, %s389_s9  ;;  %p39_p4 = scmp.eq.s32.totalorder %s441_s13, 0 }
   0xa   : > { %s457_s18 = scalar_select %p23_p1, %s397_s11, %s25_s16  }
   0xb   : > { %p459_p5 = por %p33_p2, %p32_p0  ;;  %p463_p6 = por %p39_p4, %p38_p3 }
   0xc   : > { %p83_p7 = scmp.eq.s32.totalorder %s441_s13, 1  ;;  %p89_p8 = scmp.eq.s32.totalorder %s247_s14, 1 }
   0xd   : > { %p271_p10 = scmp.lt.s32.totalorder %s401_s12, 2  ;;  %s112_s23 = sand.u32 1, %s397_s11  }
   0xe   : > { %p470_p11 = por %p83_p7, %p32_p0  ;;  %p474_p12 = por %p89_p8, %p38_p3 }
   0xf   : > { %s251_s24 = sshll.u32 %s401_s12, 5  ;;  %s250_s25 = sshll.u32 %s112_s23, 1 }
  0x10   : > { %s590_s21 = scalar_select %p470_p11, 1, 0 }
  0x11   : > { %s591_s22 = scalar_select %p474_p12, 1, 0 }
  0x12   : > { %s483_s28 = scalar_lea.hbm %s584_s0, %s251_s24  ;;  %s116_s29 = scalar_lea.vmem [#allocation2], %s250_s25 }
  0x13   : > { %s123_s30 = sshll.u32 %s116_s29, 4  ;;  %p487_p13 = pnand %p271_p10, %p459_p5  ;;  %s491_s30 = int_to_ptr.vmem [resolvable:$true] %s123_s30 }
  0x14   : > { %s113_s4 = scalar_lea.sflag [#allocation3], %s112_s23  ;;  %s305_s5 = scalar_lea.hbm %s483_s28, 32 }
  0x15   : > { %p306_p2 = scmp.ne.s32.totalorder %s483_s28, %s305_s5  ;;  %p307_p3 = pneg %p487_p13 }
  0x16   : > { %s310_s8 = scalar_lea.hbm %s584_s0, 64  ;;  %p311_p5 = scmp.lt.u32.totalorder %s483_s28, %s584_s0 }
  0x17   : > { %p308_p4 = pnand %p307_p3, %p306_p2  ;;  %p312_p8 = scmp.lt.u32.totalorder %s310_s8, %s305_s5 }
  0x18   : > { %p314_p9 = scmp.lt.u32.totalorder %s305_s5, %s483_s28 }
  0x19   : > { %p309_p7 = pneg %p308_p4  ;;  %p313_p10 = por %p312_p8, %p311_p5 }
  0x1b   : > { %p315_p0 = por %p314_p9, %p313_p10 }
  0x1d   : > { %p316_p1 = pnand %p315_p0, %p309_p7 }
  0x1f   : > { %319 = shalt.err (!%p316_p1)
}
  0x20   : > { %s320_s17 = scalar_lea.vmem %s491_s30, 32  ;;  %s403_s19 = smov [#allocation2]  }
  0x21   : > { %p321_p2 = scmp.ne.s32.totalorder %s491_s30, %s320_s17  ;;  %s325_s23 = sshll.u32 %s403_s19, 4  ;;  %s326_s23 = int_to_ptr.vmem [resolvable:$false] %s325_s23 }
  0x22   : > { %s327_s24 = scalar_lea.vmem %s326_s23, 64  ;;  %p328_p11 = scmp.lt.s32.totalorder %s491_s30, %s326_s23 }
  0x23   : > { %p323_p4 = pnand %p321_p2, %p307_p3  ;;  %p329_p5 = scmp.lt.s32.totalorder %s327_s24, %s320_s17 }
  0x25   : > { %p324_p12 = pneg %p323_p4  ;;  %p330_p8 = por %p329_p5, %p328_p11 }
  0x27   : > { %p331_p9 = pnand %p330_p8, %p324_p12 }
  0x29   : > { %334 = shalt.err (!%p331_p9)
}
  0x2a   : > { %266 = dma.hbm_to_vmem [thread:$0]  (!%p487_p13), %s483_s28, 32, %s491_s30, %s113_s4  }
  0x2b   : > { %p593_p0 = scmp.lt.s32.totalorder %s401_s12, 3  ;;  %p594_p1 = scmp.ge.s32.totalorder %s401_s12, 1 }
  0x2d   : > { %p129_p3 = pnand %p594_p1, %p593_p0 }
  0x2e   : > { %s525_s25 = sand.u32 (!%p129_p3), 1, %s393_s10  }
  0x2f   : > { %132 = sbr.rel (%p129_p3) target bundleno = 81 (0x51), region = 28  ;;  %s253_s26 = sshll.u32 (!%p129_p3), %s525_s25, 1 }
  0x30   : > { %s135_s27 = scalar_lea.sflag (!%p129_p3), [#allocation3], %s525_s25  ;;  %s138_s29 = scalar_lea.vmem (!%p129_p3), [#allocation2], %s253_s26 }
  0x36   : > { %380 = dma.done.wait (%p463_p6), %s135_s27, 32  }
  0x37   : > { %382 = vsyncadd (%p463_p6), %s135_s27, 4294967264  ;;  %s158_s28 = scalar_lea.vmem [#allocation5], %s253_s26  ;;  %s256_s3 = sshll.u32 %s441_s13, 5  ;;  %v159_v0 = vld [vmem:[%s138_s29] sm:$0x3] }
  0x38   : > { %s177_s30 = sshll.u32 %s158_s28, 4  ;;  %v160_v1 = vld [vmem:[%s585_s1] sm:$0x3]  ;;  %s542_s20 = scalar_lea.hbm %s586_s2, %s256_s3  ;;  %s537_s30 = int_to_ptr.vmem [resolvable:$true] %s177_s30 }
  0x39   : > { %v161_v2 = vadd.f32 %v160_v1, %v159_v0  ;;  %s164_s8 = scalar_lea.sflag [#allocation4], %s525_s25  ;;  %s335_s14 = scalar_lea.vmem %s537_s30, 32 }
  0x3a   : > { %p336_p6 = scmp.ne.s32.totalorder %s537_s30, %s335_s14  ;;  %p595_p11 = scmp.ne.s32.totalorder %s590_s21, 0 }
  0x3b   : > { %162 = vst [vmem:[%s158_s28] sm:$0x3] %v161_v2  ;;  %s404_s13 = smov [#allocation5]  }
  0x3c   : > { %p337_p12 = pnand %p336_p6, %p595_p11  ;;  %s339_s16 = sshll.u32 %s404_s13, 4  ;;  %s340_s16 = int_to_ptr.vmem [resolvable:$false] %s339_s16 }
  0x3d   : > { %s341_s17 = scalar_lea.vmem %s340_s16, 64  ;;  %p342_p7 = scmp.lt.s32.totalorder %s537_s30, %s340_s16 }
  0x3e   : > { %p338_p13 = pneg %p337_p12  ;;  %p343_p10 = scmp.lt.s32.totalorder %s341_s17, %s335_s14 }
  0x40   : > { %p344_p2 = por %p343_p10, %p342_p7 }
  0x42   : > { %p345_p4 = pnand %p344_p2, %p338_p13 }
  0x44   : > { %348 = shalt.err (!%p345_p4)
}
  0x45   : > { %s349_s19 = scalar_lea.hbm %s542_s20, 32  ;;  %s353_s25 = scalar_lea.hbm %s586_s2, 64 }
  0x46   : > { %p350_p5 = scmp.ne.s32.totalorder %s542_s20, %s349_s19  ;;  %p354_p0 = scmp.lt.u32.totalorder %s542_s20, %s586_s2 }
  0x47   : > { %p355_p1 = scmp.lt.u32.totalorder %s353_s25, %s349_s19  ;;  %p357_p6 = scmp.lt.u32.totalorder %s349_s19, %s542_s20 }
  0x48   : > { %p351_p8 = pnand %p350_p5, %p595_p11 }
  0x49   : > { %p356_p3 = por %p355_p1, %p354_p0 }
  0x4a   : > { %p352_p9 = pneg %p351_p8 }
  0x4b   : > { %p358_p12 = por %p357_p6, %p356_p3 }
  0x4d   : > { %p359_p13 = pnand %p358_p12, %p352_p9 }
  0x4f   : > { %362 = shalt.err (!%p359_p13)
}
  0x50   : > { %261 = dma.vmem_to_hbm [thread:$0]  (%p595_p11), %s537_s30, 32, %s542_s20, %s164_s8  }
  0x51 PF: > { %s189_s29 = sand.u32 1, %s389_s9   ;;  %p596_p7 = scmp.ne.s32.totalorder %s591_s22, 0 }
  0x52   : > { %p597_p10 = scmp.ge.s32.totalorder %s401_s12, 2  ;;  %s190_s28 = scalar_lea.sflag [#allocation4], %s189_s29 }
  0x54   : > { %p268_p2 = pnand %p597_p10, %p596_p7 }
  0x56   : > { %384 = dma.done.wait (!%p268_p2), %s190_s28, 32  }
  0x57   : > { %386 = vsyncadd (!%p268_p2), %s190_s28, 4294967264  ;;  %p15_p4 = scmp.ge.s32.totalorder %s445_s15, 4   ;;  %s598_s9 = smov %s393_s10 }
  0x58   : > { %s599_s10 = smov %s397_s11  ;;  %s600_s11 = smov %s457_s18 }
  0x59   : > { %s601_s12 = smov %s445_s15  ;;  %17 = sbr.rel (!%p15_p4) target bundleno = 5 (0x5), region = 73 }
  0x60   :  { %195 = vsyncpa [#allocation3], 1 }
  0x61   :  { %197 = vsyncpa [#allocation3 + $0x1], 1 }
  0x62   :  { %198 = vsyncpa [#allocation4], 1 }
  0x63   :  { %200 = vsyncpa [#allocation4 + $0x1], 1 }

</bundles_post_ra>
